<compile_context>
chip_gen: v6e
topology: v6e:2x2x1
jax: 0.10.0
libtpu: 0.0.40
codegen_flags: <defaults>
</compile_context>

<pallas_src>
import functools

import jax
import jax.numpy as jnp
from jax.experimental import pallas as pl
from jax.experimental.pallas import tpu as pltpu

BACKBONE_FEATURES = 384   # timm levit_128 num_features
EMBEDDING_DIM = 128


def _round_up(x, m):
    return (x + m - 1) // m * m


def _vmem_capacity_bytes():
    try:
        return int(pltpu.get_tpu_info().vmem_capacity_bytes)
    except Exception:
        return 64 * 1024 * 1024   # conservative fallback (v7x per-TC VMEM)


def _choose_batch_tile(B, row_stream_bytes, resident_bytes, vmem_cap):
    """Largest multiple-of-8 batch tile whose double-buffered x/out stream fits
    ~55% of this generation's VMEM; capped to keep >=2 grid steps (v7x
    megacore) when that still leaves >=256-row tiles."""
    if B <= 8:
        return int(B)                              # single full-array block
    budget = int(vmem_cap * 0.55) - 2 * resident_bytes
    per_row = 2 * row_stream_bytes                 # double-buffered in + out
    tb = max(8, budget // max(per_row, 1))
    tb = min(tb, 1024)
    tb = min(tb, (B // 8) * 8)                     # never exceed the array
    half = _round_up(pl.cdiv(B, 2), 8)
    if half >= 256:                                # cheap megacore split
        tb = min(tb, half)
    return int(max(8, (tb // 8) * 8))


def embedding_net_kernel(x_ref, wb_ref, bb_ref, wf_ref, bf_ref, o_ref,
                         *, C, HW, HW_pad):
    # x_ref : (TB, C*HW_pad) f32, batch-tiled stream (lane dim multiple of 128)
    # wb_ref: (C, 384) f32   bb_ref: (1, 384) f32
    # wf_ref: (384, 128) bf16   bf_ref: (1, 128) f32
    # o_ref : (TB, 128) f32  (lane-dense: exactly 128 wide -> unmasked stores)
    tb = x_ref.shape[0]
    inv_hw = 1.0 / float(HW)

    # Global average pool per channel + C->384 projection as C broadcast-FMAs
    # on the VPU (K=C is far too small for the MXU; keeps the MXU free for fc).
    acc = jnp.zeros((tb, BACKBONE_FEATURES), jnp.float32)
    for c in range(C):  # static unroll, C is tiny; slices are lane-aligned
        pooled_c = jnp.sum(x_ref[:, c * HW_pad:(c + 1) * HW_pad],
                           axis=-1, keepdims=True) * inv_hw        # (TB, 1)
        acc = acc + pooled_c * wb_ref[c:c + 1, :]
    feat = jax.nn.gelu(acc + bb_ref[...])                           # (TB, 384)

    # fc: 384 -> 128 on the MXU, bf16 operands, f32 accumulation.
    y = jnp.dot(feat.astype(jnp.bfloat16), wf_ref[...],
                preferred_element_type=jnp.float32) + bf_ref[...]   # (TB, 128)

    # F.normalize(p=2, dim=1): y / max(||y||, 1e-12) == y * rsqrt(max(ss, 1e-24))
    sumsq = jnp.sum(y * y, axis=-1, keepdims=True)
    inv_norm = jax.lax.rsqrt(jnp.maximum(sumsq, 1e-24))             # EUP
    o_ref[...] = (y * inv_norm).astype(o_ref.dtype)


def embedding_net_forward(x_nchw, params):
    """x_nchw: (B, C, H, W) float32 -> (B, EMBEDDING_DIM) L2-normalized f32."""
    B, C, H, W = x_nchw.shape
    HW = H * W
    HW_pad = _round_up(HW, 128)
    wb, bb, wf, bf = params
    wf_bf16 = wf.astype(jnp.bfloat16)   # tiny (384x128), VMEM-resident

    # Glue: flatten so the lane dim is the large C*HW axis.  The reshape is a
    # free view for contiguous NCHW; no dtype cast (x streams as f32).
    if HW_pad != HW:
        # Only for lane-misaligned spatial sizes: zero-pad each channel to a
        # multiple of 128 lanes (mean still divides by HW).
        x_flat = jnp.pad(x_nchw.reshape(B, C, HW),
                         ((0, 0), (0, 0), (0, HW_pad - HW))).reshape(B, C * HW_pad)
    else:
        x_flat = x_nchw.reshape(B, C * HW)
    CHWp = C * HW_pad

    vmem_cap = _vmem_capacity_bytes()
    resident_bytes = (wb.size + bb.size + bf.size) * 4 + wf_bf16.size * 2
    row_stream_bytes = (CHWp + EMBEDDING_DIM) * 4
    tb = _choose_batch_tile(B, row_stream_bytes, resident_bytes, vmem_cap)
    grid = (pl.cdiv(B, tb),)            # ragged last block; no wrapper-side pad

    kernel = functools.partial(embedding_net_kernel, C=C, HW=HW, HW_pad=HW_pad)

    flops = B * (2 * C * HW + 2 * C * BACKBONE_FEATURES
                 + 2 * BACKBONE_FEATURES * EMBEDDING_DIM)
    bytes_accessed = (x_flat.size * 4 + B * EMBEDDING_DIM * 4 + resident_bytes)

    out = pl.pallas_call(
        kernel,
        out_shape=jax.ShapeDtypeStruct((B, EMBEDDING_DIM), jnp.float32),
        grid=grid,
        in_specs=[
            pl.BlockSpec((tb, CHWp), lambda b: (b, 0)),                     # streamed
            pl.BlockSpec((C, BACKBONE_FEATURES), lambda b: (0, 0)),         # resident
            pl.BlockSpec((1, BACKBONE_FEATURES), lambda b: (0, 0)),         # resident
            pl.BlockSpec((BACKBONE_FEATURES, EMBEDDING_DIM), lambda b: (0, 0)),
            pl.BlockSpec((1, EMBEDDING_DIM), lambda b: (0, 0)),
        ],
        out_specs=pl.BlockSpec((tb, EMBEDDING_DIM), lambda b: (b, 0)),
        compiler_params=pltpu.CompilerParams(
            dimension_semantics=("parallel",),        # megacore split on v7x
            vmem_limit_bytes=int(vmem_cap * 0.75),
        ),
        cost_estimate=pl.CostEstimate(
            flops=int(flops),
            transcendentals=int(B * BACKBONE_FEATURES),
            bytes_accessed=int(bytes_accessed),
        ),
    )(x_flat, wb, bb, wf_bf16, bf)

    return out


def _reference_forward(x_nchw, params):
    """Pure-JAX reference (same precisions as the kernel) for numerical sanity."""
    wb, bb, wf, bf = params
    B, C, H, W = x_nchw.shape
    pooled = jnp.mean(x_nchw.astype(jnp.float32).reshape(B, C, H * W), axis=-1)
    feat = jax.nn.gelu(pooled @ wb + bb)
    y = jnp.dot(feat.astype(jnp.bfloat16), wf.astype(jnp.bfloat16),
                preferred_element_type=jnp.float32) + bf
    norm = jnp.sqrt(jnp.sum(y * y, axis=-1, keepdims=True))
    return y / jnp.maximum(norm, 1e-12)


def init_params(key, in_channels):
    """Deterministic PyTorch-Linear-style init (uniform +-1/sqrt(fan_in))."""
    k1, k2, k3, k4 = jax.random.split(key, 4)
    lim_b = 1.0 / jnp.sqrt(jnp.float32(in_channels))
    wb = jax.random.uniform(k1, (in_channels, BACKBONE_FEATURES),
                            jnp.float32, -lim_b, lim_b)
    bb = jax.random.uniform(k2, (1, BACKBONE_FEATURES),
                            jnp.float32, -lim_b, lim_b)
    lim_f = 1.0 / jnp.sqrt(jnp.float32(BACKBONE_FEATURES))
    wf = jax.random.uniform(k3, (BACKBONE_FEATURES, EMBEDDING_DIM),
                            jnp.float32, -lim_f, lim_f)
    bf = jax.random.uniform(k4, (1, EMBEDDING_DIM),
                            jnp.float32, -lim_f, lim_f)
    return wb, bb, wf, bf


if __name__ == "__main__":
    key = jax.random.PRNGKey(0)
    k_x, k_p = jax.random.split(key)

    B, C, H, W = 2, 3, 16, 16
    x = jax.random.normal(k_x, (B, C, H, W), jnp.float32)
    params = init_params(k_p, C)

    out = jax.block_until_ready(embedding_net_forward(x, params))

    # sanity: output shape, unit-norm rows, agreement with pure-JAX reference
    assert out.shape == (B, EMBEDDING_DIM)
    norms = jnp.linalg.norm(out, axis=1)
    assert bool(jnp.all(jnp.abs(norms - 1.0) < 1e-4))

    ref = _reference_forward(x, params)
    assert bool(jnp.max(jnp.abs(out - ref)) < 2e-3)

    print("KERNEL_OK")
</pallas_src>

<mosaic_0001>
module attributes {stable_mosaic.version = 11 : i64} {
  func.func @embedding_net_kernel(%arg0: i32, %arg1: memref<2x768xf32, #tpu.memory_space<vmem>>, %arg2: memref<3x384xf32, #tpu.memory_space<vmem>>, %arg3: memref<1x384xf32, #tpu.memory_space<vmem>>, %arg4: memref<384x128xbf16, #tpu.memory_space<vmem>>, %arg5: memref<1x128xf32, #tpu.memory_space<vmem>>, %arg6: memref<2x128xf32, #tpu.memory_space<vmem>>) attributes {dimension_semantics = [#tpu.dimension_semantics<parallel>], iteration_bounds = array<i64: 1>, scalar_prefetch = 0 : i64, scratch_operands = 0 : i64, tpu.core_type = #tpu.core_type<tc>, window_params = [{transform_indices = @transform_0, window_bounds = array<i64: 2, 768>}, {pipeline_mode = #tpu.pipeline_mode<synchronous>, transform_indices = @transform_1, window_bounds = array<i64: 3, 384>}, {pipeline_mode = #tpu.pipeline_mode<synchronous>, transform_indices = @transform_2, window_bounds = array<i64: 1, 384>}, {pipeline_mode = #tpu.pipeline_mode<synchronous>, transform_indices = @transform_3, window_bounds = array<i64: 384, 128>}, {pipeline_mode = #tpu.pipeline_mode<synchronous>, transform_indices = @transform_4, window_bounds = array<i64: 1, 128>}, {transform_indices = @transform_5, window_bounds = array<i64: 2, 128>}]} {
    %cst = arith.constant 0.000000e+00 : f32
    %0 = vector.broadcast %cst : f32 to vector<2x384xf32>
    %c0 = arith.constant 0 : index
    %c0_0 = arith.constant 0 : index
    %1 = vector.load %arg1[%c0, %c0_0] : memref<2x768xf32, #tpu.memory_space<vmem>>, vector<2x256xf32>
    %cst_1 = arith.constant dense<0.000000e+00> : vector<2xf32>
    %2 = vector.multi_reduction <add>, %1, %cst_1 [1] : vector<2x256xf32> to vector<2xf32>
    %3 = vector.shape_cast %2 : vector<2xf32> to vector<2x1xf32>
    %cst_2 = arith.constant 3.906250e-03 : f32
    %4 = vector.broadcast %cst_2 : f32 to vector<2x1xf32>
    %5 = arith.mulf %3, %4 : vector<2x1xf32>
    %c0_3 = arith.constant 0 : index
    %c0_4 = arith.constant 0 : index
    %6 = vector.load %arg2[%c0_3, %c0_4] : memref<3x384xf32, #tpu.memory_space<vmem>>, vector<1x384xf32>
    %7 = vector.broadcast %5 : vector<2x1xf32> to vector<2x384xf32>
    %8 = vector.broadcast %6 : vector<1x384xf32> to vector<2x384xf32>
    %9 = arith.mulf %7, %8 : vector<2x384xf32>
    %10 = arith.addf %0, %9 : vector<2x384xf32>
    %c0_5 = arith.constant 0 : index
    %c256 = arith.constant 256 : index
    %11 = vector.load %arg1[%c0_5, %c256] : memref<2x768xf32, #tpu.memory_space<vmem>>, vector<2x256xf32>
    %cst_6 = arith.constant dense<0.000000e+00> : vector<2xf32>
    %12 = vector.multi_reduction <add>, %11, %cst_6 [1] : vector<2x256xf32> to vector<2xf32>
    %13 = vector.shape_cast %12 : vector<2xf32> to vector<2x1xf32>
    %cst_7 = arith.constant 3.906250e-03 : f32
    %14 = vector.broadcast %cst_7 : f32 to vector<2x1xf32>
    %15 = arith.mulf %13, %14 : vector<2x1xf32>
    %c1 = arith.constant 1 : index
    %c0_8 = arith.constant 0 : index
    %16 = vector.load %arg2[%c1, %c0_8] : memref<3x384xf32, #tpu.memory_space<vmem>>, vector<1x384xf32>
    %17 = vector.broadcast %15 : vector<2x1xf32> to vector<2x384xf32>
    %18 = vector.broadcast %16 : vector<1x384xf32> to vector<2x384xf32>
    %19 = arith.mulf %17, %18 : vector<2x384xf32>
    %20 = arith.addf %10, %19 : vector<2x384xf32>
    %c0_9 = arith.constant 0 : index
    %c512 = arith.constant 512 : index
    %21 = vector.load %arg1[%c0_9, %c512] : memref<2x768xf32, #tpu.memory_space<vmem>>, vector<2x256xf32>
    %cst_10 = arith.constant dense<0.000000e+00> : vector<2xf32>
    %22 = vector.multi_reduction <add>, %21, %cst_10 [1] : vector<2x256xf32> to vector<2xf32>
    %23 = vector.shape_cast %22 : vector<2xf32> to vector<2x1xf32>
    %cst_11 = arith.constant 3.906250e-03 : f32
    %24 = vector.broadcast %cst_11 : f32 to vector<2x1xf32>
    %25 = arith.mulf %23, %24 : vector<2x1xf32>
    %c2 = arith.constant 2 : index
    %c0_12 = arith.constant 0 : index
    %26 = vector.load %arg2[%c2, %c0_12] : memref<3x384xf32, #tpu.memory_space<vmem>>, vector<1x384xf32>
    %27 = vector.broadcast %25 : vector<2x1xf32> to vector<2x384xf32>
    %28 = vector.broadcast %26 : vector<1x384xf32> to vector<2x384xf32>
    %29 = arith.mulf %27, %28 : vector<2x384xf32>
    %30 = arith.addf %20, %29 : vector<2x384xf32>
    %c0_13 = arith.constant 0 : index
    %c0_14 = arith.constant 0 : index
    %31 = vector.load %arg3[%c0_13, %c0_14] : memref<1x384xf32, #tpu.memory_space<vmem>>, vector<1x384xf32>
    %32 = vector.broadcast %31 : vector<1x384xf32> to vector<2x384xf32>
    %33 = arith.addf %30, %32 : vector<2x384xf32>
    %34 = arith.mulf %33, %33 : vector<2x384xf32>
    %35 = arith.mulf %33, %34 : vector<2x384xf32>
    %cst_15 = arith.constant 4.471500e-02 : f32
    %36 = vector.broadcast %cst_15 : f32 to vector<2x384xf32>
    %37 = arith.mulf %36, %35 : vector<2x384xf32>
    %38 = arith.addf %33, %37 : vector<2x384xf32>
    %cst_16 = arith.constant 0.797884583 : f32
    %39 = vector.broadcast %cst_16 : f32 to vector<2x384xf32>
    %40 = arith.mulf %39, %38 : vector<2x384xf32>
    %41 = math.tanh %40 : vector<2x384xf32>
    %cst_17 = arith.constant 1.000000e+00 : f32
    %42 = vector.broadcast %cst_17 : f32 to vector<2x384xf32>
    %43 = arith.addf %42, %41 : vector<2x384xf32>
    %cst_18 = arith.constant 5.000000e-01 : f32
    %44 = vector.broadcast %cst_18 : f32 to vector<2x384xf32>
    %45 = arith.mulf %44, %43 : vector<2x384xf32>
    %46 = arith.mulf %33, %45 : vector<2x384xf32>
    %47 = arith.truncf %46 : vector<2x384xf32> to vector<2x384xbf16>
    %c0_19 = arith.constant 0 : index
    %c0_20 = arith.constant 0 : index
    %48 = vector.load %arg4[%c0_19, %c0_20] : memref<384x128xbf16, #tpu.memory_space<vmem>>, vector<384x128xbf16>
    %cst_21 = arith.constant dense<0.000000e+00> : vector<2x128xf32>
    %49 = tpu.matmul %47, %48, %cst_21 {dimension_numbers = #tpu.dot_dimension_numbers<[1], [0], [0], [1], [0, 0, 1, 1], [], []>} : vector<2x384xbf16>, vector<384x128xbf16>, vector<2x128xf32> -> vector<2x128xf32>
    %c0_22 = arith.constant 0 : index
    %c0_23 = arith.constant 0 : index
    %50 = vector.load %arg5[%c0_22, %c0_23] : memref<1x128xf32, #tpu.memory_space<vmem>>, vector<1x128xf32>
    %51 = vector.broadcast %50 : vector<1x128xf32> to vector<2x128xf32>
    %52 = arith.addf %49, %51 : vector<2x128xf32>
    %53 = arith.mulf %52, %52 : vector<2x128xf32>
    %cst_24 = arith.constant dense<0.000000e+00> : vector<2xf32>
    %54 = vector.multi_reduction <add>, %53, %cst_24 [1] : vector<2x128xf32> to vector<2xf32>
    %55 = vector.shape_cast %54 : vector<2xf32> to vector<2x1xf32>
    %cst_25 = arith.constant 1.000000e-24 : f32
    %56 = vector.broadcast %cst_25 : f32 to vector<2x1xf32>
    %57 = arith.maximumf %55, %56 : vector<2x1xf32>
    %58 = math.rsqrt %57 : vector<2x1xf32>
    %59 = vector.broadcast %58 : vector<2x1xf32> to vector<2x128xf32>
    %60 = arith.mulf %52, %59 : vector<2x128xf32>
    %c0_26 = arith.constant 0 : index
    %c0_27 = arith.constant 0 : index
    %61 = vector.load %arg6[%c0_26, %c0_27] : memref<2x128xf32, #tpu.memory_space<vmem>>, vector<2x128xf32>
    tpu.vector_store %arg6[%c0_26, %c0_27], %60 {strides = array<i32>} : memref<2x128xf32, #tpu.memory_space<vmem>>, vector<2x128xf32>,
    return
  }
  func.func @transform_0(%arg0: i32) -> (i32, i32) {
    %c0_i32 = arith.constant 0 : i32
    %c0_i32_0 = arith.constant 0 : i32
    return %arg0, %c0_i32 : i32, i32
  }
  func.func @transform_1(%arg0: i32) -> (i32, i32) {
    %c0_i32 = arith.constant 0 : i32
    %c0_i32_0 = arith.constant 0 : i32
    %c0_i32_1 = arith.constant 0 : i32
    return %c0_i32, %c0_i32_0 : i32, i32
  }
  func.func @transform_2(%arg0: i32) -> (i32, i32) {
    %c0_i32 = arith.constant 0 : i32
    %c0_i32_0 = arith.constant 0 : i32
    %c0_i32_1 = arith.constant 0 : i32
    return %c0_i32, %c0_i32_0 : i32, i32
  }
  func.func @transform_3(%arg0: i32) -> (i32, i32) {
    %c0_i32 = arith.constant 0 : i32
    %c0_i32_0 = arith.constant 0 : i32
    %c0_i32_1 = arith.constant 0 : i32
    return %c0_i32, %c0_i32_0 : i32, i32
  }
  func.func @transform_4(%arg0: i32) -> (i32, i32) {
    %c0_i32 = arith.constant 0 : i32
    %c0_i32_0 = arith.constant 0 : i32
    %c0_i32_1 = arith.constant 0 : i32
    return %c0_i32, %c0_i32_0 : i32, i32
  }
  func.func @transform_5(%arg0: i32) -> (i32, i32) {
    %c0_i32 = arith.constant 0 : i32
    %c0_i32_0 = arith.constant 0 : i32
    return %arg0, %c0_i32 : i32, i32
  }
}

</mosaic_0001>

<bundles_post_ra>
// kernel: tpu_custom_call.1
= control target key start
LH: loop header
LB: loop body
LE: loop exit
PB: predicated region body
PF: predicated region fallthrough
CT: control target
= control target key end

     0   :  { %10 = vsyncpa [#allocation3], 0  ;;  %s806_s0 = inlined_call_operand.hbm [shape: f32[2,768], index: 0, kind: input, shape index: {}]   ;;  %s807_s1 = inlined_call_operand.hbm [shape: f32[3,384], index: 1, kind: input, shape index: {}]   ;;  %s808_s2 = inlined_call_operand.vmem [shape: f32[1,384], index: 2, kind: input, shape index: {}]   ;;  %s809_s3 = inlined_call_operand.hbm [shape: bf16[384,128], index: 3, kind: input, shape index: {}]   ;;  %s810_s4 = inlined_call_operand.vmem [shape: f32[1,128], index: 4, kind: input, shape index: {}]   ;;  %s811_s5 = inlined_call_operand.hbm [shape: f32[2,128], index: 5, kind: output, shape index: {}]  }
   0x1   :  { %11 = vsyncpa [#allocation6], 0 }
   0x2   :  { %12 = vsyncpa [#allocation4], 0  ;;  %s743_s18 = smov [#allocation5]   ;;  %s744_s20 = smov [#allocation2]  }
   0x3   :  { %s29_s19 = sshll.u32 %s743_s18, 4  ;;  %s19_s21 = sshll.u32 %s744_s20, 4  ;;  %s30_s19 = int_to_ptr.vmem [resolvable:$true] %s29_s19  ;;  %s20_s21 = int_to_ptr.vmem [resolvable:$true] %s19_s21 }
   0x4   :  { %s665_s22 = scalar_lea.vmem %s30_s19, 192  ;;  %p670_p1 = scmp.lt.s32.totalorder %s30_s19, %s30_s19 }
   0x5   :  { %p666_p0 = scmp.ne.s32.totalorder %s30_s19, %s665_s22  ;;  %p671_p2 = scmp.lt.s32.totalorder %s665_s22, %s665_s22 }
   0x7   :  { %p672_p3 = por %p671_p2, %p670_p1 }
   0x9   :  { %p673_p4 = pnand %p672_p3, %p666_p0 }
   0xb   :  { %676 = shalt.err (!%p673_p4)
}
   0xc   :  { %32 = dma.hbm_to_vmem [thread:$0]  %s807_s1, 192, %s30_s19, [#allocation6]  }
   0xd   :  { %s685_s25 = scalar_lea.vmem %s20_s21, 192  ;;  %p690_p6 = scmp.lt.s32.totalorder %s20_s21, %s20_s21 }
   0xe   :  { %p686_p5 = scmp.ne.s32.totalorder %s20_s21, %s685_s25  ;;  %p691_p7 = scmp.lt.s32.totalorder %s685_s25, %s685_s25 }
  0x10   :  { %p692_p8 = por %p691_p7, %p690_p6 }
  0x12   :  { %p693_p9 = pnand %p692_p8, %p686_p5 }
  0x14   :  { %696 = shalt.err (!%p693_p9)
}
  0x15   :  { %22 = dma.hbm_to_vmem [thread:$0]  %s806_s0, 192, %s20_s21, [#allocation3]  }
  0x16   :  { %s745_s28 = smov [#allocation7]  }
  0x17   :  { %s40_s29 = sshll.u32 %s745_s28, 4  ;;  %s41_s29 = int_to_ptr.vmem [resolvable:$true] %s40_s29 }
  0x18   :  { %s705_s30 = scalar_lea.vmem %s41_s29, 3072  ;;  %p710_p11 = scmp.lt.s32.totalorder %s41_s29, %s41_s29 }
  0x19   :  { %p706_p10 = scmp.ne.s32.totalorder %s41_s29, %s705_s30  ;;  %p711_p12 = scmp.lt.s32.totalorder %s705_s30, %s705_s30 }
  0x1b   :  { %p712_p13 = por %p711_p12, %p710_p11 }
  0x1d   :  { %p713_p0 = pnand %p712_p13, %p706_p10 }
  0x1f   :  { %716 = shalt.err (!%p713_p0)
}
  0x20   :  { %s746_s1 = smov 64   ;;  %s747_s6 = smov 4  }
  0x21   :  { %46 = dma.hbm_to_vmem [thread:$0]  %s809_s3, 3072, %s41_s29, [#allocation6], %s746_s1, %s746_s1, %s747_s6  }
  0x22   :  { %737 = dma.done.wait [#allocation3], 192  }
  0x23   :  { %738 = vsyncadd [#allocation3], 4294967104 }
  0x24   :  { %739 = dma.done.wait [#allocation6], 3264  }
  0x25   :  { %740 = vsyncadd [#allocation6], 4294964032  ;;  %vm71_vm0 = vcmask 1041408   ;;  %v625_v15 = vld [vmem:[#allocation7 + $0x78] sm:$0xff]   ;;  %v748_v18 = vmov 0.0   ;;  %v628_v19 = vld [vmem:[#allocation7 + $0x70] sm:$0xff]   ;;  %v80_v40 = vlaneseq }
  0x26   :  { %v538_v0 = vld.sshfl [vmem:[#allocation2] sm:$0x33 pattern:$0x76325410]  ;;  %v626_v16 = vld [vmem:[#allocation7 + $0xb8] sm:$0xff]   ;;  %597 = vmatprep.subr.bf16.mxu1 %v748_v18  ;;  %vm749_vm1 = vmmov 0   ;;  %566 = vmatprep.subr.bf16.mxu0 %v625_v15 }
  0x27   :  { %v68_v1 = vcombine.high %v538_v0, %v538_v0  ;;  %v72_v2 = vsel %vm71_vm0, %v538_v0, 0.0  ;;  %v539_v3 = vld.sshfl [vmem:[#allocation2 + $0x4] sm:$0x33 pattern:$0x76325410]  ;;  %v627_v17 = vld [vmem:[#allocation7 + $0x38] sm:$0xff]   ;;  %613 = vmatprep.mubr.msk.bf16.mxu1 %vm749_vm1, %v748_v18  ;;  %598 = vmatpush3.bf16.msra.mxu1 %v626_v16 }
  0x28   :  { %v110_v4 = vcombine.high %v539_v3, %v539_v3  ;;  %v540_v5 = vld.sshfl [vmem:[#allocation2 + $0x8] sm:$0x33 pattern:$0x76325410]  ;;  %v113_v7 = vsel %vm71_vm0, %v539_v3, 0.0  ;;  %567 = vmatpush3.bf16.msra.mxu0 %v627_v17  ;;  %599 = vmatprep.subr.bf16.mxu1 %v748_v18  ;;  %v631_v22 = vld [vmem:[#allocation7 + $0x68] sm:$0xff]  }
  0x29   :  { %v73_v6 = vsel %vm71_vm0, %v68_v1, 0.0  ;;  %v152_v8 = vcombine.high %v540_v5, %v540_v5  ;;  %v155_v9 = vsel %vm71_vm0, %v540_v5, 0.0  ;;  %v629_v20 = vld [vmem:[#allocation7 + $0xb0] sm:$0xff]   ;;  %568 = vmatprep.subr.bf16.mxu0 %v628_v19  ;;  %v632_v23 = vld [vmem:[#allocation7 + $0xa8] sm:$0xff]   ;;  %v634_v25 = vld [vmem:[#allocation7 + $0x60] sm:$0xff]   ;;  %v81_v41 = vshrl.u32 %v80_v40, 7 }
  0x2a   :  { %v74_v10 = vadd.f32 %v73_v6, %v72_v2  ;;  %v114_v11 = vsel %vm71_vm0, %v110_v4, 0.0  ;;  %v630_v21 = vld [vmem:[#allocation7 + $0x30] sm:$0xff]   ;;  %v633_v24 = vld [vmem:[#allocation7 + $0x28] sm:$0xff]   ;;  %v635_v26 = vld [vmem:[#allocation7 + $0xa0] sm:$0xff]   ;;  %s750_s10 = smov [#allocation8]  }
  0x2b   :  { %v156_v12 = vsel %vm71_vm0, %v152_v8, 0.0  ;;  %v115_v13 = vadd.f32 %v114_v11, %v113_v7  ;;  %600 = vmatpush3.bf16.msra.mxu1 %v629_v20  ;;  %v636_v27 = vld [vmem:[#allocation7 + $0x20] sm:$0xff]   ;;  %v637_v28 = vld [vmem:[#allocation7 + $0x58] sm:$0xff]   ;;  %v640_v31 = vld [vmem:[#allocation7 + $0x50] sm:$0xff]   ;;  %v82_v42 = vsub.s32 0, %v81_v41  ;;  %v86_v43 = vsub.s32 1, %v81_v41 }
  0x2c   :  { %75 = vadd.xlane.f32.xlu0 %v74_v10  ;;  %v157_v14 = vadd.f32 %v156_v12, %v155_v9  ;;  %569 = vmatpush3.bf16.msra.mxu0 %v630_v21  ;;  %v638_v29 = vld [vmem:[#allocation7 + $0x98] sm:$0xff]   ;;  %v641_v32 = vld [vmem:[#allocation7 + $0x90] sm:$0xff]   ;;  %v643_v34 = vld [vmem:[#allocation7 + $0x48] sm:$0xff]   ;;  %v90_v45 = vsub.s32 2, %v81_v41  ;;  %s528_s11 = sshll.u32 %s750_s10, 4  ;;  %s529_s11 = int_to_ptr.vmem [resolvable:$true] %s528_s11 }
  0x2d   :  { %601 = vmatprep.subr.bf16.mxu1 %v748_v18  ;;  %570 = vmatprep.subr.bf16.mxu0 %v631_v22  ;;  %v639_v30 = vld [vmem:[#allocation7 + $0x18] sm:$0xff]   ;;  %v642_v33 = vld [vmem:[#allocation7 + $0x10] sm:$0xff]   ;;  %v644_v35 = vld [vmem:[#allocation7 + $0x88] sm:$0xff]   ;;  %p722_p2 = scmp.lt.s32.totalorder %s529_s11, %s529_s11 }
  0x2e   :  { %158 = vadd.xlane.f32.xlu1 %v157_v14  ;;  %v645_v36 = vld [vmem:[#allocation7 + $0x8] sm:$0xff]   ;;  %v646_v37 = vld [vmem:[#allocation7 + $0x40] sm:$0xff]   ;;  %v78_v44 = vld [vmem:[#allocation5] ss:$4 sm:$0x7] }
  0x2f   :  { %602 = vmatpush3.bf16.msra.mxu1 %v632_v23  ;;  %v647_v38 = vld [vmem:[#allocation7 + $0x80] sm:$0xff]   ;;  %v120_v46 = vld [vmem:[#allocation5 + $0x1] ss:$4 sm:$0x7]  ;;  %v83_v49 = vrot.slane %v78_v44, %v82_v42  ;;  %v87_v50 = vrot.slane %v78_v44, %v86_v43  ;;  %v91_v52 = vrot.slane %v78_v44, %v90_v45  ;;  %v185_v0 = vld [vmem:[%s808_s2] sm:$0x7] }
  0x30   :  { %116 = vadd.xlane.f32.xlu0 %v115_v13  ;;  %571 = vmatpush3.bf16.msra.mxu0 %v633_v24  ;;  %v648_v39 = vld [vmem:[#allocation7] sm:$0xff]   ;;  %v162_v47 = vld [vmem:[#allocation5 + $0x2] ss:$4 sm:$0x7]  ;;  %v125_v53 = vrot.slane %v120_v46, %v82_v42  ;;  %v129_v57 = vrot.slane %v120_v46, %v86_v43  ;;  %v133_v58 = vrot.slane %v120_v46, %v90_v45 }
  0x31   :  { %603 = vmatprep.subr.bf16.mxu1 %v748_v18  ;;  %572 = vmatprep.subr.bf16.mxu0 %v634_v25  ;;  %v167_v54 = vrot.slane %v162_v47, %v82_v42  ;;  %v171_v55 = vrot.slane %v162_v47, %v86_v43  ;;  %v175_v59 = vrot.slane %v162_v47, %v90_v45 }
  0x32   :  { %v190_v9 = vrot.slane %v185_v0, %v82_v42  ;;  %v198_v10 = vrot.slane %v185_v0, %v90_v45  ;;  %v194_v14 = vrot.slane %v185_v0, %v86_v43 }
  0x33   :  { %604 = vmatpush3.bf16.msra.mxu1 %v635_v26 }
  0x34   :  { %573 = vmatpush3.bf16.msra.mxu0 %v636_v27  ;;  %605 = vmatprep.subr.bf16.mxu1 %v748_v18 }
  0x35   :  { %574 = vmatprep.subr.bf16.mxu0 %v637_v28 }
  0x37   :  { %606 = vmatpush3.bf16.msra.mxu1 %v638_v29 }
  0x38   :  { %575 = vmatpush3.bf16.msra.mxu0 %v639_v30  ;;  %607 = vmatprep.subr.bf16.mxu1 %v748_v18 }
  0x39   :  { %576 = vmatprep.subr.bf16.mxu0 %v640_v31 }
  0x3b   :  { %608 = vmatpush3.bf16.msra.mxu1 %v641_v32 }
  0x3c   :  { %577 = vmatpush3.bf16.msra.mxu0 %v642_v33  ;;  %609 = vmatprep.subr.bf16.mxu1 %v748_v18 }
  0x3d   :  { %578 = vmatprep.subr.bf16.mxu0 %v643_v34 }
  0x3f   :  { %610 = vmatpush3.bf16.msra.mxu1 %v644_v35 }
  0x40   :  { %579 = vmatpush3.bf16.msra.mxu0 %v645_v36  ;;  %611 = vmatprep.subr.bf16.mxu1 %v748_v18 }
  0x41   :  { %580 = vmatprep.subr.bf16.mxu0 %v646_v37 }
  0x43   :  { %612 = vmatpush3.bf16.msra.mxu1 %v647_v38 }
  0x44   :  { %581 = vmatpush3.bf16.msra.mxu0 %v648_v39 }
  0xb5   :  { %v76_v48 = vpop.xlane.xlu0 %75 }
  0xb6   :  { %v77_v51 = vmul.f32 0.00390625, %v76_v48 }
  0xb7   :  { %v159_v56 = vpop.xlane.xlu1 %158 }
  0xb8   :  { %v160_v60 = vmul.f32 0.00390625, %v159_v56  ;;  %v95_v62 = vmul.f32 %v83_v49, %v77_v51  ;;  %v96_v1 = vmul.f32 %v87_v50, %v77_v51  ;;  %v97_v2 = vmul.f32 %v91_v52, %v77_v51 }
  0xb9   :  { %v117_v61 = vpop.xlane.xlu0 %116 }
  0xba   :  { %v118_v63 = vmul.f32 0.00390625, %v117_v61  ;;  %v179_v3 = vmul.f32 %v167_v54, %v160_v60  ;;  %v180_v4 = vmul.f32 %v171_v55, %v160_v60  ;;  %v181_v8 = vmul.f32 %v175_v59, %v160_v60  ;;  %v541_v54 = vld [vmem:[%s810_s4] ss:$0 sm:$0xff]  ;;  %s717_s4 = scalar_lea.vmem %s529_s11, 32 }
  0xbb   :  { %p718_p1 = scmp.ne.s32.totalorder %s529_s11, %s717_s4  ;;  %p723_p3 = scmp.lt.s32.totalorder %s717_s4, %s717_s4 }
  0xbc   :  { %v137_v5 = vmul.f32 %v125_v53, %v118_v63  ;;  %v138_v6 = vmul.f32 %v129_v57, %v118_v63  ;;  %v139_v7 = vmul.f32 %v133_v58, %v118_v63 }
  0xbd   :  { %p724_p4 = por %p723_p3, %p722_p2 }
  0xbe   :  { %v140_v11 = vadd.f32 %v137_v5, %v95_v62  ;;  %v141_v12 = vadd.f32 %v138_v6, %v96_v1  ;;  %v142_v13 = vadd.f32 %v139_v7, %v97_v2 }
  0xbf   :  { %p725_p5 = pnand %p724_p4, %p718_p1 }
  0xc0   :  { %v182_v15 = vadd.f32 %v179_v3, %v140_v11  ;;  %v183_v16 = vadd.f32 %v180_v4, %v141_v12  ;;  %v184_v17 = vadd.f32 %v181_v8, %v142_v13 }
  0xc2   :  { %v202_v18 = vadd.f32 %v190_v9, %v182_v15  ;;  %v204_v19 = vadd.f32 %v198_v10, %v184_v17  ;;  %v203_v20 = vadd.f32 %v194_v14, %v183_v16 }
  0xc4   :  { %v206_v21 = vmul.f32 %v203_v20, %v203_v20  ;;  %v207_v22 = vmul.f32 %v204_v19, %v204_v19  ;;  %v205_v23 = vmul.f32 %v202_v18, %v202_v18 }
  0xc6   :  { %v209_v24 = vmul.f32 %v206_v21, %v203_v20  ;;  %v210_v25 = vmul.f32 %v207_v22, %v204_v19  ;;  %v208_v26 = vmul.f32 %v205_v23, %v202_v18 }
  0xc8   :  { %v212_v27 = vmul.f32 0.044715, %v209_v24  ;;  %v213_v28 = vmul.f32 0.044715, %v210_v25  ;;  %v211_v29 = vmul.f32 0.044715, %v208_v26 }
  0xca   :  { %v215_v30 = vadd.f32 %v212_v27, %v203_v20  ;;  %v216_v31 = vadd.f32 %v213_v28, %v204_v19  ;;  %v214_v32 = vadd.f32 %v211_v29, %v202_v18 }
  0xcc   :  { %v218_v33 = vmul.f32 0.7978846, %v215_v30  ;;  %v219_v34 = vmul.f32 0.7978846, %v216_v31  ;;  %v217_v35 = vmul.f32 0.7978846, %v214_v32 }
  0xce   :  { %649 = vtanh.f32 %v218_v33 }
  0xcf   :  { %651 = vtanh.f32 %v219_v34 }
  0xd0   :  { %653 = vtanh.f32 %v217_v35 }
  0xdb   :  { %v650_v36 = vpop.eup %649 }
  0xdc   :  { %v652_v37 = vpop.eup %651  ;;  %v224_v38 = vadd.f32 1.0, %v650_v36 }
  0xdd   :  { %v654_v39 = vpop.eup %653  ;;  %v225_v40 = vadd.f32 1.0, %v652_v37 }
  0xde   :  { %v227_v41 = vmul.f32 0.5, %v224_v38  ;;  %v223_v42 = vadd.f32 1.0, %v654_v39 }
  0xdf   :  { %v228_v43 = vmul.f32 0.5, %v225_v40 }
  0xe0   :  { %v230_v44 = vmul.f32 %v227_v41, %v203_v20  ;;  %v226_v45 = vmul.f32 0.5, %v223_v42 }
  0xe1   :  { %v231_v46 = vmul.f32 %v228_v43, %v204_v19 }
  0xe2   :  { %v233_v47 = vpack.c.bf16 %v230_v44, %v230_v44  ;;  %v229_v48 = vmul.f32 %v226_v45, %v202_v18 }
  0xe3   :  { %v234_v49 = vpack.c.bf16 %v231_v46, %v231_v46 }
  0xe4   :  { %466 = vmatprep.mubr.bf16.mxu0 %v233_v47  ;;  %v232_v50 = vpack.c.bf16 %v229_v48, %v229_v48 }
  0xe5   :  { %614 = vmatmul.mubr.bf16.vlgmr.msra.gmra.mxu1 %v234_v49 }
  0xe6   :  { %467 = vmatmul.mubr.bf16.vlgmr.msra.gmra.mxu0 %v232_v50 }
 0x1a5   :  { %v508_v51 = vpop.f32.mrf.mxu1 }
 0x1a6   :  { %v582_v52 = vpop.f32.mrf.mxu0 }
 0x1a7   :  { %v615_v53 = vpop.f32.mrf.mxu1 }
 0x1a8   :  { %v583_v55 = vpop.f32.mrf.mxu0 }
 0x1a9   :  { %v584_v56 = vadd.f32 %v583_v55, %v582_v52  ;;  %v511_v57 = vpop.f32.mrf.mxu1 }
 0x1aa   :  { %v585_v58 = vpop.f32.mrf.mxu0 }
 0x1ab   :  { %v469_v59 = vadd.f32 %v584_v56, %v541_v54  ;;  %v616_v60 = vpop.f32.mrf.mxu1 }
 0x1ac   :  { %v586_v61 = vpop.f32.mrf.mxu0 }
 0x1ad   :  { %v509_v62 = vadd.f32 %v508_v51, %v469_v59 }
 0x1af   :  { %v514_v63 = vmul.f32 %v509_v62, %v509_v62 }
 0x1b1   :  { %v515_v0 = vsel %vm71_vm0, %v514_v63, 0.0 }
 0x1b2   :  { %516 = vadd.xlane.f32.xlu1 %v515_v0 }
 0x23b   :  { %v517_v1 = vpop.xlane.xlu1 %516 }
 0x23c   :  { %v518_v2 = vmax.f32 %v517_v1, 1e-24 }
 0x23e   :  { %655 = vrsqrt.f32 %v518_v2 }
 0x24b   :  { %v656_v3 = vpop.eup %655 }
 0x24c   :  { %v520_v4 = vmul.f32 %v656_v3, %v509_v62 }
 0x24e   :  { %521 = vst [vmem:[#allocation8] sm:$0x3] %v520_v4 }
 0x24f   :  { %728 = shalt.err (!%p725_p5)
}
 0x250   :  { %531 = dma.vmem_to_hbm [thread:$0]  %s529_s11, 32, %s811_s5, [#allocation4]  }
 0x251   :  { %741 = dma.done.wait [#allocation4], 32  }
 0x252   :  { %742 = vsyncadd [#allocation4], 4294967264 }
 0x253   :  { %535 = vsyncpa [#allocation3], 1 }
 0x254   :  { %536 = vsyncpa [#allocation6], 1 }
 0x255   :  { %537 = vsyncpa [#allocation4], 1 }

</bundles_post_ra>
